<compile_context>
chip_gen: v6e
topology: v6e:2x2x1
jax: 0.10.0
libtpu: 0.0.40
codegen_flags: <defaults>
</compile_context>

<pallas_src>
import functools

import jax
import jax.numpy as jnp
from jax.experimental import pallas as pl
from jax.experimental.pallas import tpu as pltpu


def _round_up(x, m):
    return (x + m - 1) // m * m


def _feedforward_kernel(x_ref, w1_ref, b1_ref, w2_ref, b2_ref,
                        gamma_ref, beta_ref, o_ref, *,
                        epsilon, matmul_dtype, approx_reciprocal):
    # x tile: (tm, D). Matmul operands stay in their storage dtype (bf16 runs
    # the MXU at full rate); accumulation and the epilogue are f32.
    x = x_ref[...]
    x_f32 = x.astype(jnp.float32)
    x_mm = x if matmul_dtype is None else x.astype(matmul_dtype)

    # --- conv1: Linear(D -> H) + ReLU (f32 accumulate) ----------------------
    h = jnp.dot(x_mm, w1_ref[...], preferred_element_type=jnp.float32)
    h = jnp.maximum(h + b1_ref[...].astype(jnp.float32), 0.0)
    h_mm = h if matmul_dtype is None else h.astype(matmul_dtype)

    # --- conv2: Linear(H -> D) + residual (f32) -----------------------------
    y = jnp.dot(h_mm, w2_ref[...], preferred_element_type=jnp.float32)
    y = y + b2_ref[...].astype(jnp.float32) + x_f32

    # --- layer_normalization (torch.std: unbiased var, eps added to std) ----
    d = y.shape[-1]
    mean = jnp.mean(y, axis=-1, keepdims=True)
    diff = y - mean
    var_unbiased = jnp.sum(diff * diff, axis=-1, keepdims=True) * (1.0 / (d - 1))
    std = jnp.sqrt(var_unbiased)
    inv = pl.reciprocal(std + epsilon, approx=approx_reciprocal)   # (tm, 1), EUP slot
    out = diff * inv * gamma_ref[...].astype(jnp.float32) \
        + beta_ref[...].astype(jnp.float32)

    o_ref[...] = out.astype(o_ref.dtype)


def feedforward_pallas(x, w1, b1, w2, b2, gamma, beta, *,
                       epsilon=1e-8, tm=256, matmul_dtype=None,
                       approx_reciprocal=True):
    """x: (B, T, D); w1: (D, H); b1: (H,); w2: (H, D); b2: (D,); gamma/beta: (D,).

    matmul_dtype: None -> keep input/weight dtype on the MXU (no f32 promotion);
    jnp.bfloat16 -> cast matmul operands to bf16 (f32 accumulation / epilogue).
    """
    B, T, D = x.shape
    Dw, H = w1.shape
    assert Dw == D and w2.shape == (H, D), "residual requires num_units[1] == in_channels"

    M = B * T
    # Row tile: large enough to feed the MXU and amortize per-step overhead,
    # but keep grid length >= 2 so both v7x TensorCores get work.
    tm_eff = max(8, min(tm, _round_up(-(-M // 2), 8)))
    Mp = _round_up(M, tm_eff)

    x2 = x.reshape(M, D)
    if Mp != M:
        x2 = jnp.pad(x2, ((0, Mp - M), (0, 0)))

    # Weights in the matmul dtype (halves their VMEM footprint for bf16);
    # biases / affine params in f32 for the f32 epilogue.
    w_dtype = x.dtype if matmul_dtype is None else matmul_dtype
    w1c = w1.astype(w_dtype)
    w2c = w2.astype(w_dtype)
    b1r = b1.astype(jnp.float32).reshape(1, H)
    b2r = b2.astype(jnp.float32).reshape(1, D)
    gr = gamma.astype(jnp.float32).reshape(1, D)
    br = beta.astype(jnp.float32).reshape(1, D)

    kernel = functools.partial(
        _feedforward_kernel, epsilon=epsilon,
        matmul_dtype=matmul_dtype, approx_reciprocal=approx_reciprocal)

    grid = (Mp // tm_eff,)

    # Explicit VMEM budget (keeps us within v7x's 64 MiB per core).
    itemsz = lambda dt: jnp.dtype(dt).itemsize
    est = (2 * tm_eff * D * itemsz(x.dtype)          # x tile, double-buffered
           + 2 * tm_eff * D * itemsz(x.dtype)        # out tile, double-buffered
           + 2 * (D * H + H * D) * itemsz(w_dtype)   # weights (worst case: 2 bufs)
           + 4 * tm_eff * max(H, D) * 4              # f32 intermediates (h, y, ...)
           + 4 * (H + 3 * D) * 4)                    # biases / gamma / beta
    vmem_limit = int(min(100 << 20, max(32 << 20, est * 2)))

    def build(single_buffer_params):
        def const_spec(shape):
            # Grid-invariant operands: request single buffering so only one
            # copy of W1/W2 lives in VMEM (frees room for a larger row tile).
            if single_buffer_params:
                return pl.BlockSpec(shape, lambda i: (0, 0),
                                    pipeline_mode=pl.Buffered(1))
            return pl.BlockSpec(shape, lambda i: (0, 0))

        return pl.pallas_call(
            kernel,
            out_shape=jax.ShapeDtypeStruct((Mp, D), x.dtype),
            grid_spec=pltpu.PrefetchScalarGridSpec(
                num_scalar_prefetch=0,
                grid=grid,
                in_specs=[
                    pl.BlockSpec((tm_eff, D), lambda i: (i, 0)),  # x rows
                    const_spec((D, H)),                           # W1 (resident)
                    const_spec((1, H)),                           # b1
                    const_spec((H, D)),                           # W2 (resident)
                    const_spec((1, D)),                           # b2
                    const_spec((1, D)),                           # gamma
                    const_spec((1, D)),                           # beta
                ],
                out_specs=pl.BlockSpec((tm_eff, D), lambda i: (i, 0)),
            ),
            compiler_params=pltpu.CompilerParams(
                dimension_semantics=("parallel",),
                vmem_limit_bytes=vmem_limit),
        )

    args = (x2, w1c, b1r, w2c, b2r, gr, br)
    try:
        out = build(single_buffer_params=True)(*args)
    except Exception:
        # Fallback if single-buffered pipeline_mode is rejected by this jax/Mosaic.
        out = build(single_buffer_params=False)(*args)

    return out[:M].reshape(B, T, D)


def _reference(x, w1, b1, w2, b2, gamma, beta, epsilon=1e-8):
    h = jnp.maximum(x @ w1 + b1, 0.0)
    y = h @ w2 + b2 + x
    mean = y.mean(-1, keepdims=True)
    diff = y - mean
    std = jnp.sqrt((diff * diff).sum(-1, keepdims=True) / (y.shape[-1] - 1))
    return gamma * diff / (std + epsilon) + beta


if __name__ == "__main__":
    # Small shapes consistent with the module (residual requires
    # num_units[1] == in_channels).
    B, T = 2, 8
    in_channels = 128          # D
    num_units = [256, 128]     # [H, D]
    H, D = num_units[0], in_channels

    key = jax.random.PRNGKey(0)
    kx, k1, k2, k3, k4 = jax.random.split(key, 5)

    x = jax.random.normal(kx, (B, T, D), dtype=jnp.float32)

    # PyTorch nn.Linear-style init: U(-1/sqrt(fan_in), 1/sqrt(fan_in))
    bound1 = 1.0 / jnp.sqrt(D)
    w1 = jax.random.uniform(k1, (D, H), jnp.float32, -bound1, bound1)
    b1 = jax.random.uniform(k2, (H,), jnp.float32, -bound1, bound1)
    bound2 = 1.0 / jnp.sqrt(H)
    w2 = jax.random.uniform(k3, (H, D), jnp.float32, -bound2, bound2)
    b2 = jax.random.uniform(k4, (D,), jnp.float32, -bound2, bound2)

    gamma = jnp.ones((D,), jnp.float32)   # layer_normalization.gamma
    beta = jnp.zeros((D,), jnp.float32)   # layer_normalization.beta

    ref = _reference(x, w1, b1, w2, b2, gamma, beta)

    # 1) Exact path (f32 matmuls, exact reciprocal): tight semantic check.
    out_exact = feedforward_pallas(x, w1, b1, w2, b2, gamma, beta,
                                   matmul_dtype=None, approx_reciprocal=False)
    out_exact = jax.block_until_ready(out_exact)
    assert out_exact.shape == (B, T, D)
    assert jnp.allclose(out_exact, ref, atol=1e-4, rtol=1e-4), "exact-path mismatch"

    # 2) EUP approximate reciprocal in the LayerNorm epilogue.
    out_approx = feedforward_pallas(x, w1, b1, w2, b2, gamma, beta,
                                    matmul_dtype=None, approx_reciprocal=True)
    out_approx = jax.block_until_ready(out_approx)
    assert jnp.allclose(out_approx, ref, atol=5e-3, rtol=5e-3), "approx-recip mismatch"

    # 3) Full fast path: bf16 MXU operands, f32 accumulation + f32 epilogue.
    out_fast = feedforward_pallas(x, w1, b1, w2, b2, gamma, beta,
                                  matmul_dtype=jnp.bfloat16, approx_reciprocal=True)
    out_fast = jax.block_until_ready(out_fast)
    assert jnp.allclose(out_fast, ref, atol=3e-2, rtol=3e-2), "bf16-path mismatch"

    print("KERNEL_OK")
</pallas_src>

<mosaic_0001>
module attributes {stable_mosaic.version = 11 : i64} {
  func.func @_feedforward_kernel(%arg0: i32, %arg1: memref<8x128xf32, #tpu.memory_space<vmem>>, %arg2: memref<128x256xf32, #tpu.memory_space<vmem>>, %arg3: memref<1x256xf32, #tpu.memory_space<vmem>>, %arg4: memref<256x128xf32, #tpu.memory_space<vmem>>, %arg5: memref<1x128xf32, #tpu.memory_space<vmem>>, %arg6: memref<1x128xf32, #tpu.memory_space<vmem>>, %arg7: memref<1x128xf32, #tpu.memory_space<vmem>>, %arg8: memref<8x128xf32, #tpu.memory_space<vmem>>) attributes {dimension_semantics = [#tpu.dimension_semantics<parallel>], iteration_bounds = array<i64: 2>, scalar_prefetch = 0 : i64, scratch_operands = 0 : i64, tpu.core_type = #tpu.core_type<tc>, window_params = [{transform_indices = @transform_0, window_bounds = array<i64: 8, 128>}, {pipeline_mode = #tpu.pipeline_mode<synchronous>, transform_indices = @transform_1, window_bounds = array<i64: 128, 256>}, {pipeline_mode = #tpu.pipeline_mode<synchronous>, transform_indices = @transform_2, window_bounds = array<i64: 1, 256>}, {pipeline_mode = #tpu.pipeline_mode<synchronous>, transform_indices = @transform_3, window_bounds = array<i64: 256, 128>}, {pipeline_mode = #tpu.pipeline_mode<synchronous>, transform_indices = @transform_4, window_bounds = array<i64: 1, 128>}, {pipeline_mode = #tpu.pipeline_mode<synchronous>, transform_indices = @transform_5, window_bounds = array<i64: 1, 128>}, {pipeline_mode = #tpu.pipeline_mode<synchronous>, transform_indices = @transform_6, window_bounds = array<i64: 1, 128>}, {transform_indices = @transform_7, window_bounds = array<i64: 8, 128>}]} {
    %c0 = arith.constant 0 : index
    %c0_0 = arith.constant 0 : index
    %0 = vector.load %arg1[%c0, %c0_0] : memref<8x128xf32, #tpu.memory_space<vmem>>, vector<8x128xf32>
    %c0_1 = arith.constant 0 : index
    %c0_2 = arith.constant 0 : index
    %1 = vector.load %arg2[%c0_1, %c0_2] : memref<128x256xf32, #tpu.memory_space<vmem>>, vector<128x256xf32>
    %cst = arith.constant dense<0.000000e+00> : vector<8x256xf32>
    %2 = tpu.matmul %0, %1, %cst {dimension_numbers = #tpu.dot_dimension_numbers<[1], [0], [0], [1], [0, 0, 1, 1], [], []>} : vector<8x128xf32>, vector<128x256xf32>, vector<8x256xf32> -> vector<8x256xf32>
    %c0_3 = arith.constant 0 : index
    %c0_4 = arith.constant 0 : index
    %3 = vector.load %arg3[%c0_3, %c0_4] : memref<1x256xf32, #tpu.memory_space<vmem>>, vector<1x256xf32>
    %4 = vector.broadcast %3 : vector<1x256xf32> to vector<8x256xf32>
    %5 = arith.addf %2, %4 : vector<8x256xf32>
    %cst_5 = arith.constant 0.000000e+00 : f32
    %6 = vector.broadcast %cst_5 : f32 to vector<8x256xf32>
    %7 = arith.maximumf %5, %6 : vector<8x256xf32>
    %c0_6 = arith.constant 0 : index
    %c0_7 = arith.constant 0 : index
    %8 = vector.load %arg4[%c0_6, %c0_7] : memref<256x128xf32, #tpu.memory_space<vmem>>, vector<256x128xf32>
    %cst_8 = arith.constant dense<0.000000e+00> : vector<8x128xf32>
    %9 = tpu.matmul %7, %8, %cst_8 {dimension_numbers = #tpu.dot_dimension_numbers<[1], [0], [0], [1], [0, 0, 1, 1], [], []>} : vector<8x256xf32>, vector<256x128xf32>, vector<8x128xf32> -> vector<8x128xf32>
    %c0_9 = arith.constant 0 : index
    %c0_10 = arith.constant 0 : index
    %10 = vector.load %arg5[%c0_9, %c0_10] : memref<1x128xf32, #tpu.memory_space<vmem>>, vector<1x128xf32>
    %11 = vector.broadcast %10 : vector<1x128xf32> to vector<8x128xf32>
    %12 = arith.addf %9, %11 : vector<8x128xf32>
    %13 = arith.addf %12, %0 : vector<8x128xf32>
    %cst_11 = arith.constant dense<0.000000e+00> : vector<8xf32>
    %14 = vector.multi_reduction <add>, %13, %cst_11 [1] : vector<8x128xf32> to vector<8xf32>
    %15 = vector.shape_cast %14 : vector<8xf32> to vector<8x1xf32>
    %cst_12 = arith.constant 1.280000e+02 : f32
    %16 = vector.broadcast %cst_12 : f32 to vector<8x1xf32>
    %17 = arith.divf %15, %16 : vector<8x1xf32>
    %18 = vector.broadcast %17 : vector<8x1xf32> to vector<8x128xf32>
    %19 = arith.subf %13, %18 : vector<8x128xf32>
    %20 = arith.mulf %19, %19 : vector<8x128xf32>
    %cst_13 = arith.constant dense<0.000000e+00> : vector<8xf32>
    %21 = vector.multi_reduction <add>, %20, %cst_13 [1] : vector<8x128xf32> to vector<8xf32>
    %22 = vector.shape_cast %21 : vector<8xf32> to vector<8x1xf32>
    %cst_14 = arith.constant 0.00787401571 : f32
    %23 = vector.broadcast %cst_14 : f32 to vector<8x1xf32>
    %24 = arith.mulf %22, %23 : vector<8x1xf32>
    %25 = math.sqrt %24 : vector<8x1xf32>
    %cst_15 = arith.constant 9.99999993E-9 : f32
    %26 = vector.broadcast %cst_15 : f32 to vector<8x1xf32>
    %27 = arith.addf %25, %26 : vector<8x1xf32>
    %28 = tpu.reciprocal %27 : vector<8x1xf32> -> vector<8x1xf32>
    %29 = vector.broadcast %28 : vector<8x1xf32> to vector<8x128xf32>
    %30 = arith.mulf %19, %29 : vector<8x128xf32>
    %c0_16 = arith.constant 0 : index
    %c0_17 = arith.constant 0 : index
    %31 = vector.load %arg6[%c0_16, %c0_17] : memref<1x128xf32, #tpu.memory_space<vmem>>, vector<1x128xf32>
    %32 = vector.broadcast %31 : vector<1x128xf32> to vector<8x128xf32>
    %33 = arith.mulf %30, %32 : vector<8x128xf32>
    %c0_18 = arith.constant 0 : index
    %c0_19 = arith.constant 0 : index
    %34 = vector.load %arg7[%c0_18, %c0_19] : memref<1x128xf32, #tpu.memory_space<vmem>>, vector<1x128xf32>
    %35 = vector.broadcast %34 : vector<1x128xf32> to vector<8x128xf32>
    %36 = arith.addf %33, %35 : vector<8x128xf32>
    %c0_20 = arith.constant 0 : index
    %c0_21 = arith.constant 0 : index
    %37 = vector.load %arg8[%c0_20, %c0_21] : memref<8x128xf32, #tpu.memory_space<vmem>>, vector<8x128xf32>
    tpu.vector_store %arg8[%c0_20, %c0_21], %36 {strides = array<i32>} : memref<8x128xf32, #tpu.memory_space<vmem>>, vector<8x128xf32>,
    return
  }
  func.func @transform_0(%arg0: i32) -> (i32, i32) {
    %c0_i32 = arith.constant 0 : i32
    %c0_i32_0 = arith.constant 0 : i32
    return %arg0, %c0_i32 : i32, i32
  }
  func.func @transform_1(%arg0: i32) -> (i32, i32) {
    %c0_i32 = arith.constant 0 : i32
    %c0_i32_0 = arith.constant 0 : i32
    %c0_i32_1 = arith.constant 0 : i32
    return %c0_i32, %c0_i32_0 : i32, i32
  }
  func.func @transform_2(%arg0: i32) -> (i32, i32) {
    %c0_i32 = arith.constant 0 : i32
    %c0_i32_0 = arith.constant 0 : i32
    %c0_i32_1 = arith.constant 0 : i32
    return %c0_i32, %c0_i32_0 : i32, i32
  }
  func.func @transform_3(%arg0: i32) -> (i32, i32) {
    %c0_i32 = arith.constant 0 : i32
    %c0_i32_0 = arith.constant 0 : i32
    %c0_i32_1 = arith.constant 0 : i32
    return %c0_i32, %c0_i32_0 : i32, i32
  }
  func.func @transform_4(%arg0: i32) -> (i32, i32) {
    %c0_i32 = arith.constant 0 : i32
    %c0_i32_0 = arith.constant 0 : i32
    %c0_i32_1 = arith.constant 0 : i32
    return %c0_i32, %c0_i32_0 : i32, i32
  }
  func.func @transform_5(%arg0: i32) -> (i32, i32) {
    %c0_i32 = arith.constant 0 : i32
    %c0_i32_0 = arith.constant 0 : i32
    %c0_i32_1 = arith.constant 0 : i32
    return %c0_i32, %c0_i32_0 : i32, i32
  }
  func.func @transform_6(%arg0: i32) -> (i32, i32) {
    %c0_i32 = arith.constant 0 : i32
    %c0_i32_0 = arith.constant 0 : i32
    %c0_i32_1 = arith.constant 0 : i32
    return %c0_i32, %c0_i32_0 : i32, i32
  }
  func.func @transform_7(%arg0: i32) -> (i32, i32) {
    %c0_i32 = arith.constant 0 : i32
    %c0_i32_0 = arith.constant 0 : i32
    return %arg0, %c0_i32 : i32, i32
  }
}

module attributes {stable_mosaic.version = 11 : i64} {
  func.func @_feedforward_kernel(%arg0: i32, %arg1: memref<8x128xf32, #tpu.memory_space<vmem>>, %arg2: memref<128x256xf32, #tpu.memory_space<vmem>>, %arg3: memref<1x256xf32, #tpu.memory_space<vmem>>, %arg4: memref<256x128xf32, #tpu.memory_space<vmem>>, %arg5: memref<1x128xf32, #tpu.memory_space<vmem>>, %arg6: memref<1x128xf32, #tpu.memory_space<vmem>>, %arg7: memref<1x128xf32, #tpu.memory_space<vmem>>, %arg8: memref<8x128xf32, #tpu.memory_space<vmem>>) attributes {dimension_semantics = [#tpu.dimension_semantics<parallel>], iteration_bounds = array<i64: 2>, scalar_prefetch = 0 : i64, scratch_operands = 0 : i64, tpu.core_type = #tpu.core_type<tc>, window_params = [{transform_indices = @transform_0, window_bounds = array<i64: 8, 128>}, {pipeline_mode = #tpu.pipeline_mode<synchronous>, transform_indices = @transform_1, window_bounds = array<i64: 128, 256>}, {pipeline_mode = #tpu.pipeline_mode<synchronous>, transform_indices = @transform_2, window_bounds = array<i64: 1, 256>}, {pipeline_mode = #tpu.pipeline_mode<synchronous>, transform_indices = @transform_3, window_bounds = array<i64: 256, 128>}, {pipeline_mode = #tpu.pipeline_mode<synchronous>, transform_indices = @transform_4, window_bounds = array<i64: 1, 128>}, {pipeline_mode = #tpu.pipeline_mode<synchronous>, transform_indices = @transform_5, window_bounds = array<i64: 1, 128>}, {pipeline_mode = #tpu.pipeline_mode<synchronous>, transform_indices = @transform_6, window_bounds = array<i64: 1, 128>}, {transform_indices = @transform_7, window_bounds = array<i64: 8, 128>}]} {
    %c0 = arith.constant 0 : index
    %c0_0 = arith.constant 0 : index
    %0 = vector.load %arg1[%c0, %c0_0] : memref<8x128xf32, #tpu.memory_space<vmem>>, vector<8x128xf32>
    %c0_1 = arith.constant 0 : index
    %c0_2 = arith.constant 0 : index
    %1 = vector.load %arg2[%c0_1, %c0_2] : memref<128x256xf32, #tpu.memory_space<vmem>>, vector<128x256xf32>
    %cst = arith.constant dense<0.000000e+00> : vector<8x256xf32>
    %2 = tpu.matmul %0, %1, %cst {dimension_numbers = #tpu.dot_dimension_numbers<[1], [0], [0], [1], [0, 0, 1, 1], [], []>} : vector<8x128xf32>, vector<128x256xf32>, vector<8x256xf32> -> vector<8x256xf32>
    %c0_3 = arith.constant 0 : index
    %c0_4 = arith.constant 0 : index
    %3 = vector.load %arg3[%c0_3, %c0_4] : memref<1x256xf32, #tpu.memory_space<vmem>>, vector<1x256xf32>
    %4 = vector.broadcast %3 : vector<1x256xf32> to vector<8x256xf32>
    %5 = arith.addf %2, %4 : vector<8x256xf32>
    %cst_5 = arith.constant 0.000000e+00 : f32
    %6 = vector.broadcast %cst_5 : f32 to vector<8x256xf32>
    %7 = arith.maximumf %5, %6 : vector<8x256xf32>
    %c0_6 = arith.constant 0 : index
    %c0_7 = arith.constant 0 : index
    %8 = vector.load %arg4[%c0_6, %c0_7] : memref<256x128xf32, #tpu.memory_space<vmem>>, vector<256x128xf32>
    %cst_8 = arith.constant dense<0.000000e+00> : vector<8x128xf32>
    %9 = tpu.matmul %7, %8, %cst_8 {dimension_numbers = #tpu.dot_dimension_numbers<[1], [0], [0], [1], [0, 0, 1, 1], [], []>} : vector<8x256xf32>, vector<256x128xf32>, vector<8x128xf32> -> vector<8x128xf32>
    %c0_9 = arith.constant 0 : index
    %c0_10 = arith.constant 0 : index
    %10 = vector.load %arg5[%c0_9, %c0_10] : memref<1x128xf32, #tpu.memory_space<vmem>>, vector<1x128xf32>
    %11 = vector.broadcast %10 : vector<1x128xf32> to vector<8x128xf32>
    %12 = arith.addf %9, %11 : vector<8x128xf32>
    %13 = arith.addf %12, %0 : vector<8x128xf32>
    %cst_11 = arith.constant dense<0.000000e+00> : vector<8xf32>
    %14 = vector.multi_reduction <add>, %13, %cst_11 [1] : vector<8x128xf32> to vector<8xf32>
    %15 = vector.shape_cast %14 : vector<8xf32> to vector<8x1xf32>
    %cst_12 = arith.constant 1.280000e+02 : f32
    %16 = vector.broadcast %cst_12 : f32 to vector<8x1xf32>
    %17 = arith.divf %15, %16 : vector<8x1xf32>
    %18 = vector.broadcast %17 : vector<8x1xf32> to vector<8x128xf32>
    %19 = arith.subf %13, %18 : vector<8x128xf32>
    %20 = arith.mulf %19, %19 : vector<8x128xf32>
    %cst_13 = arith.constant dense<0.000000e+00> : vector<8xf32>
    %21 = vector.multi_reduction <add>, %20, %cst_13 [1] : vector<8x128xf32> to vector<8xf32>
    %22 = vector.shape_cast %21 : vector<8xf32> to vector<8x1xf32>
    %cst_14 = arith.constant 0.00787401571 : f32
    %23 = vector.broadcast %cst_14 : f32 to vector<8x1xf32>
    %24 = arith.mulf %22, %23 : vector<8x1xf32>
    %25 = math.sqrt %24 : vector<8x1xf32>
    %cst_15 = arith.constant 9.99999993E-9 : f32
    %26 = vector.broadcast %cst_15 : f32 to vector<8x1xf32>
    %27 = arith.addf %25, %26 : vector<8x1xf32>
    %28 = tpu.reciprocal %27 : vector<8x1xf32> -> vector<8x1xf32>
    %29 = vector.broadcast %28 : vector<8x1xf32> to vector<8x128xf32>
    %30 = arith.mulf %19, %29 : vector<8x128xf32>
    %c0_16 = arith.constant 0 : index
    %c0_17 = arith.constant 0 : index
    %31 = vector.load %arg6[%c0_16, %c0_17] : memref<1x128xf32, #tpu.memory_space<vmem>>, vector<1x128xf32>
    %32 = vector.broadcast %31 : vector<1x128xf32> to vector<8x128xf32>
    %33 = arith.mulf %30, %32 : vector<8x128xf32>
    %c0_18 = arith.constant 0 : index
    %c0_19 = arith.constant 0 : index
    %34 = vector.load %arg7[%c0_18, %c0_19] : memref<1x128xf32, #tpu.memory_space<vmem>>, vector<1x128xf32>
    %35 = vector.broadcast %34 : vector<1x128xf32> to vector<8x128xf32>
    %36 = arith.addf %33, %35 : vector<8x128xf32>
    %c0_20 = arith.constant 0 : index
    %c0_21 = arith.constant 0 : index
    %37 = vector.load %arg8[%c0_20, %c0_21] : memref<8x128xf32, #tpu.memory_space<vmem>>, vector<8x128xf32>
    tpu.vector_store %arg8[%c0_20, %c0_21], %36 {strides = array<i32>} : memref<8x128xf32, #tpu.memory_space<vmem>>, vector<8x128xf32>,
    return
  }
  func.func @transform_0(%arg0: i32) -> (i32, i32) {
    %c0_i32 = arith.constant 0 : i32
    %c0_i32_0 = arith.constant 0 : i32
    return %arg0, %c0_i32 : i32, i32
  }
  func.func @transform_1(%arg0: i32) -> (i32, i32) {
    %c0_i32 = arith.constant 0 : i32
    %c0_i32_0 = arith.constant 0 : i32
    %c0_i32_1 = arith.constant 0 : i32
    return %c0_i32, %c0_i32_0 : i32, i32
  }
  func.func @transform_2(%arg0: i32) -> (i32, i32) {
    %c0_i32 = arith.constant 0 : i32
    %c0_i32_0 = arith.constant 0 : i32
    %c0_i32_1 = arith.constant 0 : i32
    return %c0_i32, %c0_i32_0 : i32, i32
  }
  func.func @transform_3(%arg0: i32) -> (i32, i32) {
    %c0_i32 = arith.constant 0 : i32
    %c0_i32_0 = arith.constant 0 : i32
    %c0_i32_1 = arith.constant 0 : i32
    return %c0_i32, %c0_i32_0 : i32, i32
  }
  func.func @transform_4(%arg0: i32) -> (i32, i32) {
    %c0_i32 = arith.constant 0 : i32
    %c0_i32_0 = arith.constant 0 : i32
    %c0_i32_1 = arith.constant 0 : i32
    return %c0_i32, %c0_i32_0 : i32, i32
  }
  func.func @transform_5(%arg0: i32) -> (i32, i32) {
    %c0_i32 = arith.constant 0 : i32
    %c0_i32_0 = arith.constant 0 : i32
    %c0_i32_1 = arith.constant 0 : i32
    return %c0_i32, %c0_i32_0 : i32, i32
  }
  func.func @transform_6(%arg0: i32) -> (i32, i32) {
    %c0_i32 = arith.constant 0 : i32
    %c0_i32_0 = arith.constant 0 : i32
    %c0_i32_1 = arith.constant 0 : i32
    return %c0_i32, %c0_i32_0 : i32, i32
  }
  func.func @transform_7(%arg0: i32) -> (i32, i32) {
    %c0_i32 = arith.constant 0 : i32
    %c0_i32_0 = arith.constant 0 : i32
    return %arg0, %c0_i32 : i32, i32
  }
}

</mosaic_0001>

<bundles_post_ra>
// kernel: tpu_custom_call.1
= control target key start
LH: loop header
LB: loop body
LE: loop exit
PB: predicated region body
PF: predicated region fallthrough
CT: control target
= control target key end

     0   :  { %s1203_s0 = inlined_call_operand.hbm [shape: f32[16,128], index: 0, kind: input, shape index: {}]   ;;  %s1204_s1 = inlined_call_operand.hbm [shape: f32[128,256], index: 1, kind: input, shape index: {}]   ;;  %s1205_s2 = inlined_call_operand.vmem [shape: f32[1,256], index: 2, kind: input, shape index: {}]   ;;  %s1206_s3 = inlined_call_operand.hbm [shape: f32[256,128], index: 3, kind: input, shape index: {}]   ;;  %s1207_s4 = inlined_call_operand.vmem [shape: f32[1,128], index: 4, kind: input, shape index: {}]   ;;  %s1208_s5 = inlined_call_operand.vmem [shape: f32[1,128], index: 5, kind: input, shape index: {}]   ;;  %s1209_s6 = inlined_call_operand.vmem [shape: f32[1,128], index: 6, kind: input, shape index: {}]   ;;  %s1210_s7 = inlined_call_operand.hbm [shape: f32[16,128], index: 7, kind: output, shape index: {}]  }
   0x1   :  { %1215 = sst [smem:[#allocation12_spill]] %s1204_s1 }
   0x2   :  { %1216 = sst [smem:[#allocation13_spill]] %s1206_s3 }
   0x3   :  { %12 = vsyncpa [#allocation3], 0 }
   0x4   :  { %14 = vsyncpa [#allocation3 + $0x1], 0 }
   0x5   :  { %15 = vsyncpa [#allocation6], 0 }
   0x6   :  { %16 = vsyncpa [#allocation4], 0 }
   0x7   :  { %18 = vsyncpa [#allocation4 + $0x1], 0  ;;  %s1019_s24 = smov 0   ;;  %s1021_s25 = smov 0  }
   0x8   :  { %s1023_s26 = smov 0   ;;  %s1025_s27 = smov 0  }
   0x9 LB: > { %s1040_s28 = sadd.s32 4294967295, %s968_s27   ;;  %s690_s29 = sadd.s32 4294967294, %s968_s27   ;;  %s968_s27 = sphi %s1025_s27, %s1236_s27   ;;  %s964_s26 = sphi %s1023_s26, %s1235_s26   ;;  %s960_s25 = sphi %s1021_s25, %s1234_s25   ;;  %s956_s24 = sphi %s1019_s24, %s1233_s24  }
   0xa   : > { %p44_p0 = scmp.ne.s32.totalorder %s960_s25, %s956_s24  ;;  %p1211_p1 = scmp.eq.s32.totalorder %s1040_s28, 0 }
   0xb   : > { %p200_p3 = scmp.eq.s32.totalorder %s690_s29, 1  ;;  %p691_p5 = scmp.ge.s32.totalorder %s968_s27, 1 }
   0xc   : > { %p1049_p4 = por %p1211_p1, %p44_p0  ;;  %p207_p7 = scmp.lt.s32.totalorder %s968_s27, 3 }
   0xd   : > { %p1054_p6 = por %p200_p3, %p44_p0  ;;  %s970_s10 = smov [#allocation5]  }
   0xe   : > { %s1217_s30 = scalar_select %p1049_p4, 1, 0 }
   0xf   : > { %s1218_s8 = scalar_select %p1054_p6, 1, 0 }
  0x10   : > { %p1059_p8 = pnand %p691_p5, %p207_p7  ;;  %s219_s11 = sshll.u32 %s970_s10, 4  ;;  %s220_s11 = int_to_ptr.vmem [resolvable:$true] %s219_s11 }
  0x11   : > { %s971_s13 = smov [#allocation7]   ;;  %s831_s15 = scalar_lea.vmem %s220_s11, 4096 }
  0x12   : > { %s1219_s9 = scalar_select %p1059_p8, 1, 0 }
  0x13   : > { %p756_p9 = pneg %p1059_p8  ;;  %s235_s14 = sshll.u32 %s971_s13, 4  ;;  %s236_s14 = int_to_ptr.vmem [resolvable:$true] %s235_s14 }
  0x14   : > { %p832_p13 = scmp.ne.s32.totalorder %s220_s11, %s831_s15  ;;  %p839_p5 = scmp.lt.s32.totalorder %s220_s11, %s220_s11 }
  0x15   : > { %p1068_p11 = pnand %p756_p9, %p1211_p1  ;;  %p840_p7 = scmp.lt.s32.totalorder %s831_s15, %s831_s15 }
  0x17   : > { %p822_p12 = pneg %p1068_p11  ;;  %p841_p10 = por %p840_p7, %p839_p5 }
  0x19   : > { %p834_p0 = pnand %p832_p13, %p822_p12 }
  0x1b   : > { %p835_p3 = pneg %p834_p0 }
  0x1d   : > { %p842_p9 = pnand %p841_p10, %p835_p3 }
  0x1f   : > { %845 = shalt.err (!%p842_p9)
}
  0x20   : > { %s972_s16 = smov 256   ;;  %s973_s17 = smov 16  }
  0x21   : > { %s1221_s1 = sld [smem:[#allocation12_spill]]  ;;  %s857_s20 = scalar_lea.vmem %s236_s14, 4096 }
  0x22   : > { %p858_p1 = scmp.ne.s32.totalorder %s236_s14, %s857_s20  ;;  %p865_p2 = scmp.lt.s32.totalorder %s236_s14, %s236_s14 }
  0x23   : > { %p866_p6 = scmp.lt.s32.totalorder %s857_s20, %s857_s20 }
  0x24   : > { %p860_p13 = pnand %p858_p1, %p822_p12 }
  0x25   : > { %p867_p5 = por %p866_p6, %p865_p2 }
  0x26   : > { %p861_p0 = pneg %p860_p13 }
  0x27   : > { %759 = dma.hbm_to_vmem [thread:$0]  (!%p1068_p11), %s1221_s1, 4096, %s220_s11, [#allocation6], %s972_s16, %s972_s16, %s973_s17  }
  0x28   : > { %p868_p10 = pnand %p867_p5, %p861_p0 }
  0x2a   : > { %871 = shalt.err (!%p868_p10)
}
  0x2b   : > { %s974_s21 = smov 128   ;;  %s975_s22 = smov 8  }
  0x2c   : > { %s1222_s3 = sld [smem:[#allocation13_spill]]  ;;  %s1091_s10 = sadd.s32 1, %s968_s27  }
  0x2d   : > { %s28_s11 = ssub.s32 %s968_s27, %s1091_s10  ;;  %s31_s13 = sadd.s32 1, %s964_s26 }
  0x2e   : > { %p29_p1 = scmp.eq.s32.totalorder %s28_s11, 0  ;;  %p38_p2 = scmp.ne.s32.totalorder %s964_s26, %s960_s25 }
  0x2f   : > { %p39_p6 = scmp.eq.s32.totalorder %s968_s27, 0  ;;  %p1223_p3 = scmp.eq.s32.totalorder %s1040_s28, 1 }
  0x30   : > { %s1100_s15 = scalar_select %p29_p1, %s964_s26, %s31_s13  }
  0x31   : > { %p40_p12 = por %p39_p6, %p38_p2  ;;  %p1104_p7 = por %p1223_p3, %p38_p2 }
  0x32   : > { %762 = dma.hbm_to_vmem [thread:$0]  (!%p1068_p11), %s1222_s3, 4096, %s236_s14, [#allocation6], %s974_s21, %s974_s21, %s975_s22  }
  0x33   : > { %s1224_s16 = scalar_select %p1104_p7, 1, 0 }
  0x34   : > { %p773_p9 = scmp.lt.s32.totalorder %s968_s27, 2  ;;  %s258_s12 = sand.u32 1, %s964_s26  }
  0x35   : > { %s695_s17 = sshll.u32 %s258_s12, 3  ;;  %s696_s14 = sshll.u32 %s968_s27, 7 }
  0x36   : > { %s1114_s20 = scalar_lea.hbm %s1203_s0, %s696_s14  ;;  %s262_s21 = scalar_lea.vmem [#allocation2], %s695_s17 }
  0x37   : > { %s269_s22 = sshll.u32 %s262_s21, 4  ;;  %p1116_p11 = pnand %p773_p9, %p40_p12  ;;  %s270_s22 = int_to_ptr.vmem [resolvable:$true] %s269_s22 }
  0x38   : > { %s259_s29 = scalar_lea.sflag [#allocation3], %s258_s12  ;;  %s872_s11 = scalar_lea.hbm %s1114_s20, 128 }
  0x39   : > { %p873_p13 = scmp.ne.s32.totalorder %s1114_s20, %s872_s11  ;;  %p874_p0 = pneg %p1116_p11 }
  0x3a   : > { %s877_s18 = scalar_lea.hbm %s1203_s0, 256  ;;  %p878_p1 = scmp.lt.s32.totalorder %s1114_s20, %s1203_s0 }
  0x3b   : > { %p875_p5 = pnand %p874_p0, %p873_p13  ;;  %p879_p2 = scmp.lt.s32.totalorder %s877_s18, %s872_s11 }
  0x3d   : > { %p876_p10 = pneg %p875_p5  ;;  %p880_p6 = por %p879_p2, %p878_p1 }
  0x3f   : > { %p881_p12 = pnand %p880_p6, %p876_p10 }
  0x41   : > { %884 = shalt.err (!%p881_p12)
}
  0x42   : > { %s885_s21 = scalar_lea.vmem %s270_s22, 128  ;;  %s976_s12 = smov [#allocation2]  }
  0x43   : > { %p886_p3 = scmp.ne.s32.totalorder %s270_s22, %s885_s21  ;;  %s890_s1 = sshll.u32 %s976_s12, 4  ;;  %s891_s1 = int_to_ptr.vmem [resolvable:$false] %s890_s1 }
  0x44   : > { %s892_s3 = scalar_lea.vmem %s891_s1, 256  ;;  %p893_p13 = scmp.lt.s32.totalorder %s270_s22, %s891_s1 }
  0x45   : > { %p888_p9 = pnand %p886_p3, %p874_p0  ;;  %p894_p5 = scmp.lt.s32.totalorder %s892_s3, %s885_s21 }
  0x47   : > { %p889_p7 = pneg %p888_p9  ;;  %p895_p4 = por %p894_p5, %p893_p13 }
  0x49   : > { %p896_p8 = pnand %p895_p4, %p889_p7 }
  0x4b   : > { %899 = shalt.err (!%p896_p8)
}
  0x4c   : > { %766 = dma.hbm_to_vmem [thread:$0]  (!%p1116_p11), %s1114_s20, 128, %s270_s22, %s259_s29  }
  0x4d   : > { %p1226_p10 = scmp.ne.s32.totalorder %s1219_s9, 0 }
  0x4e   : > { %s1137_s11 = sand.u32 (!%p1226_p10), 1, %s960_s25   ;;  %p1227_p4 = scmp.ne.s32.totalorder (!%p1226_p10), %s1217_s30, 0 }
  0x4f   : > { %278 = sbr.rel (%p1226_p10) target bundleno = 859 (0x35b), region = 48  ;;  %s698_s13 = sshll.u32 (!%p1226_p10), %s1137_s11, 3 }
  0x50   : > { %s281_s1 = scalar_lea.sflag (!%p1226_p10), [#allocation3], %s1137_s11  ;;  %s1143_s3 = scalar_lea.vmem (!%p1226_p10), [#allocation2], %s698_s13 }
  0x54   : > { %943 = dma.done.wait (%p1227_p4), %s281_s1, 128  }
  0x55   : > { %945 = vsyncadd (%p1227_p4), %s281_s1, 4294967168  ;;  %p1228_p8 = scmp.eq.s32.totalorder %s1040_s28, 0 }
  0x57   : > { %947 = dma.done.wait (%p1228_p8), [#allocation6], 8192   ;;  %p1229_p7 = pmov %p1228_p8 }
  0x58   : > { %v977_v0 = vmov 0.0   ;;  %v355_v1 = vld [vmem:[#allocation5 + $0xf8] sm:$0xff]  ;;  %v354_v2 = vld [vmem:[#allocation5 + $0xf0] sm:$0xff]  ;;  %v353_v3 = vld [vmem:[#allocation5 + $0xe8] sm:$0xff]  ;;  %s706_s19 = sshll.u32 %s1040_s28, 7  ;;  %s322_s17 = scalar_lea.vmem [#allocation8], %s698_s13 }
  0x59   : > { %949 = vsyncadd (%p1229_p7), [#allocation6], 4294959104  ;;  %432 = vmatprep.mubr.f32.mxu0 %v977_v0  ;;  %368 = vmatprep.subr.mxu0 %v355_v1  ;;  %v352_v4 = vld [vmem:[#allocation5 + $0xe0] sm:$0xff]  ;;  %v351_v5 = vld [vmem:[#allocation5 + $0xd8] sm:$0xff]  ;;  %s601_s21 = sshll.u32 %s322_s17, 4  ;;  %s588_s30 = scalar_lea.sflag [#allocation4], %s1137_s11  ;;  %s602_s21 = int_to_ptr.vmem [resolvable:$true] %s601_s21 }
  0x5a   : > { %369 = vmatpush1.msra.mxu0 %v354_v2  ;;  %v350_v6 = vld [vmem:[#allocation5 + $0xd0] sm:$0xff]  ;;  %v349_v7 = vld [vmem:[#allocation5 + $0xc8] sm:$0xff]  ;;  %v348_v8 = vld [vmem:[#allocation5 + $0xc0] sm:$0xff]  ;;  %v358_v2 = vlaneseq  ;;  %s900_s9 = scalar_lea.vmem %s602_s21, 128  ;;  %p1230_p0 = scmp.ne.s32.totalorder %s1224_s16, 0 }
  0x5b   : > { %370 = vmatprep.subr.mxu0 %v353_v3  ;;  %v347_v9 = vld [vmem:[#allocation5 + $0xb8] sm:$0xff]  ;;  %v346_v10 = vld [vmem:[#allocation5 + $0xb0] sm:$0xff]  ;;  %v345_v11 = vld [vmem:[#allocation5 + $0xa8] sm:$0xff]  ;;  %p901_p11 = scmp.ne.s32.totalorder %s602_s21, %s900_s9  ;;  %s978_s20 = smov [#allocation8]  }
  0x5c   : > { %371 = vmatpush1.msra.mxu0 %v352_v4  ;;  %v344_v12 = vld [vmem:[#allocation5 + $0xa0] sm:$0xff]  ;;  %v343_v13 = vld [vmem:[#allocation5 + $0x98] sm:$0xff]  ;;  %v342_v14 = vld [vmem:[#allocation5 + $0x90] sm:$0xff]  ;;  %v359_v3 = vshrl.u32 %v358_v2, 7  ;;  %s904_s22 = sshll.u32 %s978_s20, 4  ;;  %s905_s22 = int_to_ptr.vmem [resolvable:$false] %s904_s22 }
  0x5d   : > { %372 = vmatprep.subr.mxu0 %v351_v5  ;;  %v472_v15 = vld [vmem:[#allocation7 + $0xf8] sm:$0xff]  ;;  %v471_v17 = vld [vmem:[#allocation7 + $0xf0] sm:$0xff]  ;;  %v341_v18 = vld [vmem:[#allocation5 + $0x88] sm:$0xff]  ;;  %p902_p1 = pnand %p901_p11, %p1230_p0  ;;  %s906_s28 = scalar_lea.vmem %s905_s22, 256 }
  0x5e   : > { %373 = vmatpush1.msra.mxu0 %v350_v6  ;;  %v456_v16 = vld [vmem:[#allocation7 + $0x78] sm:$0xff]  ;;  %709 = vmatprep.subr.mxu1 %v472_v15  ;;  %v455_v19 = vld [vmem:[#allocation7 + $0x70] sm:$0xff]  ;;  %v340_v20 = vld [vmem:[#allocation5 + $0x80] sm:$0xff]  ;;  %v360_v4 = vsub.s32 0, %v359_v3  ;;  %v364_v6 = vsub.s32 1, %v359_v3  ;;  %p907_p6 = scmp.lt.s32.totalorder %s602_s21, %s905_s22  ;;  %p908_p12 = scmp.lt.s32.totalorder %s906_s28, %s900_s9 }
  0x5f   : > { %374 = vmatprep.subr.mxu0 %v349_v7  ;;  %710 = vmatpush3.msra.mxu1 %v456_v16  ;;  %v470_v21 = vld [vmem:[#allocation7 + $0xe8] sm:$0xff]  ;;  %v339_v22 = vld [vmem:[#allocation5 + $0x78] sm:$0xff]  ;;  %v338_v24 = vld [vmem:[#allocation5 + $0x70] sm:$0xff]  ;;  %p903_p2 = pneg %p902_p1 }
  0x60   : > { %375 = vmatpush1.msra.mxu0 %v348_v8  ;;  %711 = vmatprep.subr.mxu1 %v471_v17  ;;  %v454_v23 = vld [vmem:[#allocation7 + $0x68] sm:$0xff]  ;;  %v469_v25 = vld [vmem:[#allocation7 + $0xe0] sm:$0xff]  ;;  %v468_v29 = vld [vmem:[#allocation7 + $0xd8] sm:$0xff]  ;;  %p909_p3 = por %p908_p12, %p907_p6 }
  0x61   : > { %376 = vmatprep.subr.mxu0 %v347_v9  ;;  %712 = vmatpush3.msra.mxu1 %v455_v19  ;;  %v337_v26 = vld [vmem:[#allocation5 + $0x68] sm:$0xff]  ;;  %v453_v27 = vld [vmem:[#allocation7 + $0x60] sm:$0xff]  ;;  %v335_v30 = vld [vmem:[#allocation5 + $0x58] sm:$0xff] }
  0x62   : > { %377 = vmatpush1.msra.mxu0 %v346_v10  ;;  %713 = vmatprep.subr.mxu1 %v470_v21  ;;  %v336_v28 = vld [vmem:[#allocation5 + $0x60] sm:$0xff]  ;;  %v452_v31 = vld [vmem:[#allocation7 + $0x58] sm:$0xff]  ;;  %v334_v32 = vld [vmem:[#allocation5 + $0x50] sm:$0xff]  ;;  %p910_p9 = pnand %p909_p3, %p903_p2 }
  0x63   : > { %378 = vmatprep.subr.mxu0 %v345_v11  ;;  %714 = vmatpush3.msra.mxu1 %v454_v23  ;;  %v467_v33 = vld [vmem:[#allocation7 + $0xd0] sm:$0xff]  ;;  %v333_v34 = vld [vmem:[#allocation5 + $0x48] sm:$0xff]  ;;  %v332_v36 = vld [vmem:[#allocation5 + $0x40] sm:$0xff] }
  0x64   : > { %379 = vmatpush1.msra.mxu0 %v344_v12  ;;  %715 = vmatprep.subr.mxu1 %v469_v25  ;;  %v451_v35 = vld [vmem:[#allocation7 + $0x50] sm:$0xff]  ;;  %v466_v37 = vld [vmem:[#allocation7 + $0xc8] sm:$0xff]  ;;  %v331_v38 = vld [vmem:[#allocation5 + $0x38] sm:$0xff] }
  0x65   : > { %380 = vmatprep.subr.mxu0 %v343_v13  ;;  %716 = vmatpush3.msra.mxu1 %v453_v27  ;;  %v450_v39 = vld [vmem:[#allocation7 + $0x48] sm:$0xff]  ;;  %v330_v40 = vld [vmem:[#allocation5 + $0x30] sm:$0xff]  ;;  %v465_v41 = vld [vmem:[#allocation7 + $0xc0] sm:$0xff] }
  0x66   : > { %381 = vmatpush1.msra.mxu0 %v342_v14  ;;  %717 = vmatprep.subr.mxu1 %v468_v29  ;;  %v329_v42 = vld [vmem:[#allocation5 + $0x28] sm:$0xff]  ;;  %v449_v43 = vld [vmem:[#allocation7 + $0x40] sm:$0xff]  ;;  %v464_v45 = vld [vmem:[#allocation7 + $0xb8] sm:$0xff] }
  0x67   : > { %382 = vmatprep.subr.mxu0 %v341_v18  ;;  %718 = vmatpush3.msra.mxu1 %v452_v31  ;;  %v328_v44 = vld [vmem:[#allocation5 + $0x20] sm:$0xff]  ;;  %v327_v46 = vld [vmem:[#allocation5 + $0x18] sm:$0xff]  ;;  %v326_v48 = vld [vmem:[#allocation5 + $0x10] sm:$0xff] }
  0x68   : > { %383 = vmatpush1.msra.mxu0 %v340_v20  ;;  %719 = vmatprep.subr.mxu1 %v467_v33  ;;  %v448_v47 = vld [vmem:[#allocation7 + $0x38] sm:$0xff]  ;;  %v463_v49 = vld [vmem:[#allocation7 + $0xb0] sm:$0xff]  ;;  %v325_v50 = vld [vmem:[#allocation5 + $0x8] sm:$0xff] }
  0x69   : > { %384 = vmatprep.subr.mxu0 %v339_v22  ;;  %720 = vmatpush3.msra.mxu1 %v451_v35  ;;  %v447_v51 = vld [vmem:[#allocation7 + $0x30] sm:$0xff]  ;;  %v324_v52 = vld [vmem:[#allocation5] sm:$0xff]  ;;  %v462_v53 = vld [vmem:[#allocation7 + $0xa8] sm:$0xff] }
  0x6a   : > { %385 = vmatpush1.msra.mxu0 %v338_v24  ;;  %721 = vmatprep.subr.mxu1 %v466_v37  ;;  %v323_v54 = vld [vmem:[%s1143_s3] sm:$0xff]  ;;  %v446_v55 = vld [vmem:[#allocation7 + $0x28] sm:$0xff]  ;;  %v461_v56 = vld [vmem:[#allocation7 + $0xa0] sm:$0xff]  ;;  %s599_s3 = scalar_lea.hbm %s1210_s7, %s706_s19 }
  0x6b   : > { %386 = vmatprep.subr.mxu0 %v337_v26  ;;  %722 = vmatpush3.msra.mxu1 %v450_v39  ;;  %v445_v57 = vld [vmem:[#allocation7 + $0x20] sm:$0xff]  ;;  %v460_v58 = vld [vmem:[#allocation7 + $0x98] sm:$0xff]  ;;  %v459_v60 = vld [vmem:[#allocation7 + $0x90] sm:$0xff] }
  0x6c   : > { %387 = vmatpush1.msra.mxu0 %v336_v28  ;;  %723 = vmatprep.subr.mxu1 %v465_v41  ;;  %v444_v59 = vld [vmem:[#allocation7 + $0x18] sm:$0xff]  ;;  %v443_v61 = vld [vmem:[#allocation7 + $0x10] sm:$0xff]  ;;  %v458_v62 = vld [vmem:[#allocation7 + $0x88] sm:$0xff] }
  0x6d   : > { %388 = vmatprep.subr.mxu0 %v335_v30  ;;  %724 = vmatpush3.msra.mxu1 %v449_v43  ;;  %v442_v63 = vld [vmem:[#allocation7 + $0x8] sm:$0xff]  ;;  %v457_v0 = vld [vmem:[#allocation7 + $0x80] sm:$0xff]  ;;  %v356_v5 = vld [vmem:[%s1205_s2] sm:$0x3] }
  0x6e   : > { %389 = vmatpush1.msra.mxu0 %v334_v32  ;;  %725 = vmatprep.subr.mxu1 %v464_v45  ;;  %v441_v1 = vld [vmem:[#allocation7] sm:$0xff]  ;;  %v361_v7 = vrot.slane %v356_v5, %v360_v4  ;;  %v365_v8 = vrot.slane %v356_v5, %v364_v6  ;;  %v702_v16 = vld [vmem:[%s1207_s4] ss:$0 sm:$0xff] }
  0x6f   : > { %390 = vmatprep.subr.mxu0 %v333_v34  ;;  %726 = vmatpush3.msra.mxu1 %v448_v47  ;;  %v703_v34 = vld [vmem:[%s1208_s5] ss:$0 sm:$0xff] }
  0x70   : > { %391 = vmatpush1.msra.mxu0 %v332_v36  ;;  %727 = vmatprep.subr.mxu1 %v463_v49  ;;  %v704_v36 = vld [vmem:[%s1209_s6] ss:$0 sm:$0xff] }
  0x71   : > { %392 = vmatprep.subr.mxu0 %v331_v38  ;;  %728 = vmatpush3.msra.mxu1 %v447_v51 }
  0x72   : > { %393 = vmatpush1.msra.mxu0 %v330_v40  ;;  %729 = vmatprep.subr.mxu1 %v462_v53 }
  0x73   : > { %394 = vmatprep.subr.mxu0 %v329_v42  ;;  %730 = vmatpush3.msra.mxu1 %v446_v55 }
  0x74   : > { %395 = vmatpush1.msra.mxu0 %v328_v44  ;;  %731 = vmatprep.subr.mxu1 %v461_v56 }
  0x75   : > { %396 = vmatprep.subr.mxu0 %v327_v46  ;;  %732 = vmatpush3.msra.mxu1 %v445_v57 }
  0x76   : > { %397 = vmatpush1.msra.mxu0 %v326_v48  ;;  %733 = vmatprep.subr.mxu1 %v460_v58 }
  0x77   : > { %398 = vmatprep.subr.mxu0 %v325_v50  ;;  %734 = vmatpush3.msra.mxu1 %v444_v59 }
  0x78   : > { %399 = vmatpush1.msra.mxu0 %v324_v52  ;;  %735 = vmatprep.subr.mxu1 %v459_v60 }
  0x79   : > { %433 = vmatmul.mubr.f32.vlgmr.msra.gmra.mxu0 %v323_v54  ;;  %736 = vmatpush3.msra.mxu1 %v443_v61 }
  0x7a   : > { %737 = vmatprep.subr.mxu1 %v458_v62 }
  0x7b   : > { %738 = vmatpush3.msra.mxu1 %v442_v63 }
  0x7c   : > { %739 = vmatprep.subr.mxu1 %v457_v0 }
  0x7d   : > { %740 = vmatpush3.msra.mxu1 %v441_v1 }
 0x139   : > { %v434_v9 = vpop.f32.mrf.mxu0 }
 0x13a   : > { %v435_v10 = vadd.f32 %v434_v9, %v361_v7 }
 0x13b   : > { %v436_v11 = vpop.f32.mrf.mxu0 }
 0x13c   : > { %v437_v12 = vadd.f32 %v436_v11, %v365_v8  ;;  %v439_v14 = vmax.f32 %v435_v10, 0.0 }
 0x13e   : > { %v440_v13 = vmax.f32 %v437_v12, 0.0 }
 0x140   : > { %544 = vmatprep.mubr.f32.mxu1 %v440_v13 }
 0x141   : > { %545 = vmatmul.mubr.f32.vlgmr.msra.gmra.mxu1 %v439_v14 }
 0x201   : > { %v741_v15 = vpop.f32.mrf.mxu1 }
 0x203   : > { %v742_v17 = vpop.f32.mrf.mxu1 }
 0x204   : > { %v743_v18 = vadd.f32 %v742_v17, %v741_v15 }
 0x206   : > { %v547_v19 = vadd.f32 %v743_v18, %v702_v16 }
 0x208   : > { %v550_v20 = vadd.f32 %v547_v19, %v323_v54 }
 0x20a   : > { %551 = vadd.xlane.f32.xlu0 %v550_v20 }
 0x293   : > { %v552_v21 = vpop.xlane.xlu0 %551 }
 0x294   : > { %v554_v22 = vmul.f32 0.0078125, %v552_v21 }
 0x296   : > { %v555_v23 = vsub.f32 %v550_v20, %v554_v22 }
 0x298   : > { %v556_v24 = vmul.f32 %v555_v23, %v555_v23 }
 0x29a   : > { %557 = vadd.xlane.f32.xlu0 %v556_v24 }
 0x323   : > { %v558_v25 = vpop.xlane.xlu0 %557 }
 0x324   : > { %v559_v26 = vmul.f32 0.007874016, %v558_v25 }
 0x326   : > { %816 = vrsqrt.f32 %v559_v26  ;;  %vm562_vm0 = vcmp.eq.f32.partialorder %v559_v26, inf  ;;  %v565_v29 = vand.u32 2147483648, %v559_v26  ;;  %vm564_vm1 = vcmp.eq.f32.partialorder %v559_v26, 0.0 }
 0x333   : > { %v817_v27 = vpop.eup %816 }
 0x334   : > { %v561_v28 = vmul.f32 %v817_v27, %v559_v26 }
 0x336   : > { %v563_v30 = vsel %vm562_vm0, %v559_v26, %v561_v28 }
 0x337   : > { %v566_v31 = vsel %vm564_vm1, %v565_v29, %v563_v30 }
 0x338   : > { %v567_v32 = vadd.f32 1e-08, %v566_v31 }
 0x33a   : > { %818 = vrcp.f32 %v567_v32 }
 0x347   : > { %v819_v33 = vpop.eup %818 }
 0x348   : > { %v569_v35 = vmul.f32 %v819_v33, %v555_v23 }
 0x34a   : > { %v577_v37 = vmul.f32 %v703_v34, %v569_v35 }
 0x34c   : > { %v585_v38 = vadd.f32 %v704_v36, %v577_v37 }
 0x34e   : > { %586 = vst [vmem:[%s322_s17] sm:$0xff] %v585_v38 }
 0x34f   : > { %913 = shalt.err (!%p910_p9)
}
 0x350   : > { %s914_s13 = scalar_lea.hbm %s599_s3, 128  ;;  %s918_s29 = scalar_lea.hbm %s1210_s7, 256 }
 0x351   : > { %p915_p13 = scmp.ne.s32.totalorder %s599_s3, %s914_s13  ;;  %p919_p4 = scmp.lt.s32.totalorder %s599_s3, %s1210_s7 }
 0x352   : > { %p920_p8 = scmp.lt.s32.totalorder %s918_s29, %s914_s13 }
 0x353   : > { %p916_p5 = pnand %p915_p13, %p1230_p0 }
 0x354   : > { %p921_p7 = por %p920_p8, %p919_p4 }
 0x355   : > { %p917_p10 = pneg %p916_p5 }
 0x357   : > { %p922_p11 = pnand %p921_p7, %p917_p10 }
 0x359   : > { %925 = shalt.err (!%p922_p11)
}
 0x35a   : > { %754 = dma.vmem_to_hbm [thread:$0]  (%p1230_p0), %s602_s21, 128, %s599_s3, %s588_s30  }
 0x35b PF: > { %s613_s19 = sand.u32 1, %s956_s24   ;;  %p1231_p1 = scmp.ne.s32.totalorder %s1218_s8, 0 }
 0x35c   : > { %p1232_p2 = scmp.ge.s32.totalorder %s968_s27, 2  ;;  %s614_s17 = scalar_lea.sflag [#allocation4], %s613_s19 }
 0x35e   : > { %p768_p6 = pnand %p1232_p2, %p1231_p1 }
 0x360   : > { %p769_p12 = pneg %p768_p6 }
 0x362   : > { %951 = dma.done.wait (%p769_p12), %s614_s17, 128  }
 0x363   : > { %953 = vsyncadd (%p769_p12), %s614_s17, 4294967168  ;;  %p21_p3 = scmp.ge.s32.totalorder %s1091_s10, 4   ;;  %s1233_s24 = smov %s960_s25 }
 0x364   : > { %s1234_s25 = smov %s964_s26  ;;  %s1235_s26 = smov %s1100_s15 }
 0x365   : > { %s1236_s27 = smov %s1091_s10  ;;  %23 = sbr.rel (!%p21_p3) target bundleno = 9 (0x9), region = 101 }
 0x36a   :  { %619 = vsyncpa [#allocation3], 1 }
 0x36b   :  { %621 = vsyncpa [#allocation3 + $0x1], 1 }
 0x36c   :  { %622 = vsyncpa [#allocation6], 1 }
 0x36d   :  { %623 = vsyncpa [#allocation4], 1 }
 0x36e   :  { %625 = vsyncpa [#allocation4 + $0x1], 1 }

// kernel: tpu_custom_call.1
= control target key start
LH: loop header
LB: loop body
LE: loop exit
PB: predicated region body
PF: predicated region fallthrough
CT: control target
= control target key end

     0   :  { %s1203_s0 = inlined_call_operand.hbm [shape: f32[16,128], index: 0, kind: input, shape index: {}]   ;;  %s1204_s1 = inlined_call_operand.hbm [shape: f32[128,256], index: 1, kind: input, shape index: {}]   ;;  %s1205_s2 = inlined_call_operand.vmem [shape: f32[1,256], index: 2, kind: input, shape index: {}]   ;;  %s1206_s3 = inlined_call_operand.hbm [shape: f32[256,128], index: 3, kind: input, shape index: {}]   ;;  %s1207_s4 = inlined_call_operand.vmem [shape: f32[1,128], index: 4, kind: input, shape index: {}]   ;;  %s1208_s5 = inlined_call_operand.vmem [shape: f32[1,128], index: 5, kind: input, shape index: {}]   ;;  %s1209_s6 = inlined_call_operand.vmem [shape: f32[1,128], index: 6, kind: input, shape index: {}]   ;;  %s1210_s7 = inlined_call_operand.hbm [shape: f32[16,128], index: 7, kind: output, shape index: {}]  }
   0x1   :  { %1215 = sst [smem:[#allocation12_spill]] %s1204_s1 }
   0x2   :  { %1216 = sst [smem:[#allocation13_spill]] %s1206_s3 }
   0x3   :  { %12 = vsyncpa [#allocation3], 0 }
   0x4   :  { %14 = vsyncpa [#allocation3 + $0x1], 0 }
   0x5   :  { %15 = vsyncpa [#allocation6], 0 }
   0x6   :  { %16 = vsyncpa [#allocation4], 0 }
   0x7   :  { %18 = vsyncpa [#allocation4 + $0x1], 0  ;;  %s1019_s24 = smov 0   ;;  %s1021_s25 = smov 0  }
   0x8   :  { %s1023_s26 = smov 0   ;;  %s1025_s27 = smov 0  }
   0x9 LB: > { %s1040_s28 = sadd.s32 4294967295, %s968_s27   ;;  %s690_s29 = sadd.s32 4294967294, %s968_s27   ;;  %s968_s27 = sphi %s1025_s27, %s1236_s27   ;;  %s964_s26 = sphi %s1023_s26, %s1235_s26   ;;  %s960_s25 = sphi %s1021_s25, %s1234_s25   ;;  %s956_s24 = sphi %s1019_s24, %s1233_s24  }
   0xa   : > { %p44_p0 = scmp.ne.s32.totalorder %s960_s25, %s956_s24  ;;  %p1211_p1 = scmp.eq.s32.totalorder %s1040_s28, 0 }
   0xb   : > { %p200_p3 = scmp.eq.s32.totalorder %s690_s29, 1  ;;  %p691_p5 = scmp.ge.s32.totalorder %s968_s27, 1 }
   0xc   : > { %p1049_p4 = por %p1211_p1, %p44_p0  ;;  %p207_p7 = scmp.lt.s32.totalorder %s968_s27, 3 }
   0xd   : > { %p1054_p6 = por %p200_p3, %p44_p0  ;;  %s970_s10 = smov [#allocation5]  }
   0xe   : > { %s1217_s30 = scalar_select %p1049_p4, 1, 0 }
   0xf   : > { %s1218_s8 = scalar_select %p1054_p6, 1, 0 }
  0x10   : > { %p1059_p8 = pnand %p691_p5, %p207_p7  ;;  %s219_s11 = sshll.u32 %s970_s10, 4  ;;  %s220_s11 = int_to_ptr.vmem [resolvable:$true] %s219_s11 }
  0x11   : > { %s971_s13 = smov [#allocation7]   ;;  %s831_s15 = scalar_lea.vmem %s220_s11, 4096 }
  0x12   : > { %s1219_s9 = scalar_select %p1059_p8, 1, 0 }
  0x13   : > { %p756_p9 = pneg %p1059_p8  ;;  %s235_s14 = sshll.u32 %s971_s13, 4  ;;  %s236_s14 = int_to_ptr.vmem [resolvable:$true] %s235_s14 }
  0x14   : > { %p832_p13 = scmp.ne.s32.totalorder %s220_s11, %s831_s15  ;;  %p839_p5 = scmp.lt.s32.totalorder %s220_s11, %s220_s11 }
  0x15   : > { %p1068_p11 = pnand %p756_p9, %p1211_p1  ;;  %p840_p7 = scmp.lt.s32.totalorder %s831_s15, %s831_s15 }
  0x17   : > { %p822_p12 = pneg %p1068_p11  ;;  %p841_p10 = por %p840_p7, %p839_p5 }
  0x19   : > { %p834_p0 = pnand %p832_p13, %p822_p12 }
  0x1b   : > { %p835_p3 = pneg %p834_p0 }
  0x1d   : > { %p842_p9 = pnand %p841_p10, %p835_p3 }
  0x1f   : > { %845 = shalt.err (!%p842_p9)
}
  0x20   : > { %s972_s16 = smov 256   ;;  %s973_s17 = smov 16  }
  0x21   : > { %s1221_s1 = sld [smem:[#allocation12_spill]]  ;;  %s857_s20 = scalar_lea.vmem %s236_s14, 4096 }
  0x22   : > { %p858_p1 = scmp.ne.s32.totalorder %s236_s14, %s857_s20  ;;  %p865_p2 = scmp.lt.s32.totalorder %s236_s14, %s236_s14 }
  0x23   : > { %p866_p6 = scmp.lt.s32.totalorder %s857_s20, %s857_s20 }
  0x24   : > { %p860_p13 = pnand %p858_p1, %p822_p12 }
  0x25   : > { %p867_p5 = por %p866_p6, %p865_p2 }
  0x26   : > { %p861_p0 = pneg %p860_p13 }
  0x27   : > { %759 = dma.hbm_to_vmem [thread:$0]  (!%p1068_p11), %s1221_s1, 4096, %s220_s11, [#allocation6], %s972_s16, %s972_s16, %s973_s17  }
  0x28   : > { %p868_p10 = pnand %p867_p5, %p861_p0 }
  0x2a   : > { %871 = shalt.err (!%p868_p10)
}
  0x2b   : > { %s974_s21 = smov 128   ;;  %s975_s22 = smov 8  }
  0x2c   : > { %s1222_s3 = sld [smem:[#allocation13_spill]]  ;;  %s1091_s10 = sadd.s32 1, %s968_s27  }
  0x2d   : > { %s28_s11 = ssub.s32 %s968_s27, %s1091_s10  ;;  %s31_s13 = sadd.s32 1, %s964_s26 }
  0x2e   : > { %p29_p1 = scmp.eq.s32.totalorder %s28_s11, 0  ;;  %p38_p2 = scmp.ne.s32.totalorder %s964_s26, %s960_s25 }
  0x2f   : > { %p39_p6 = scmp.eq.s32.totalorder %s968_s27, 0  ;;  %p1223_p3 = scmp.eq.s32.totalorder %s1040_s28, 1 }
  0x30   : > { %s1100_s15 = scalar_select %p29_p1, %s964_s26, %s31_s13  }
  0x31   : > { %p40_p12 = por %p39_p6, %p38_p2  ;;  %p1104_p7 = por %p1223_p3, %p38_p2 }
  0x32   : > { %762 = dma.hbm_to_vmem [thread:$0]  (!%p1068_p11), %s1222_s3, 4096, %s236_s14, [#allocation6], %s974_s21, %s974_s21, %s975_s22  }
  0x33   : > { %s1224_s16 = scalar_select %p1104_p7, 1, 0 }
  0x34   : > { %p773_p9 = scmp.lt.s32.totalorder %s968_s27, 2  ;;  %s258_s12 = sand.u32 1, %s964_s26  }
  0x35   : > { %s695_s17 = sshll.u32 %s258_s12, 3  ;;  %s696_s14 = sshll.u32 %s968_s27, 7 }
  0x36   : > { %s1114_s20 = scalar_lea.hbm %s1203_s0, %s696_s14  ;;  %s262_s21 = scalar_lea.vmem [#allocation2], %s695_s17 }
  0x37   : > { %s269_s22 = sshll.u32 %s262_s21, 4  ;;  %p1116_p11 = pnand %p773_p9, %p40_p12  ;;  %s270_s22 = int_to_ptr.vmem [resolvable:$true] %s269_s22 }
  0x38   : > { %s259_s29 = scalar_lea.sflag [#allocation3], %s258_s12  ;;  %s872_s11 = scalar_lea.hbm %s1114_s20, 128 }
  0x39   : > { %p873_p13 = scmp.ne.s32.totalorder %s1114_s20, %s872_s11  ;;  %p874_p0 = pneg %p1116_p11 }
  0x3a   : > { %s877_s18 = scalar_lea.hbm %s1203_s0, 256  ;;  %p878_p1 = scmp.lt.s32.totalorder %s1114_s20, %s1203_s0 }
  0x3b   : > { %p875_p5 = pnand %p874_p0, %p873_p13  ;;  %p879_p2 = scmp.lt.s32.totalorder %s877_s18, %s872_s11 }
  0x3d   : > { %p876_p10 = pneg %p875_p5  ;;  %p880_p6 = por %p879_p2, %p878_p1 }
  0x3f   : > { %p881_p12 = pnand %p880_p6, %p876_p10 }
  0x41   : > { %884 = shalt.err (!%p881_p12)
}
  0x42   : > { %s885_s21 = scalar_lea.vmem %s270_s22, 128  ;;  %s976_s12 = smov [#allocation2]  }
  0x43   : > { %p886_p3 = scmp.ne.s32.totalorder %s270_s22, %s885_s21  ;;  %s890_s1 = sshll.u32 %s976_s12, 4  ;;  %s891_s1 = int_to_ptr.vmem [resolvable:$false] %s890_s1 }
  0x44   : > { %s892_s3 = scalar_lea.vmem %s891_s1, 256  ;;  %p893_p13 = scmp.lt.s32.totalorder %s270_s22, %s891_s1 }
  0x45   : > { %p888_p9 = pnand %p886_p3, %p874_p0  ;;  %p894_p5 = scmp.lt.s32.totalorder %s892_s3, %s885_s21 }
  0x47   : > { %p889_p7 = pneg %p888_p9  ;;  %p895_p4 = por %p894_p5, %p893_p13 }
  0x49   : > { %p896_p8 = pnand %p895_p4, %p889_p7 }
  0x4b   : > { %899 = shalt.err (!%p896_p8)
}
  0x4c   : > { %766 = dma.hbm_to_vmem [thread:$0]  (!%p1116_p11), %s1114_s20, 128, %s270_s22, %s259_s29  }
  0x4d   : > { %p1226_p10 = scmp.ne.s32.totalorder %s1219_s9, 0 }
  0x4e   : > { %s1137_s11 = sand.u32 (!%p1226_p10), 1, %s960_s25   ;;  %p1227_p4 = scmp.ne.s32.totalorder (!%p1226_p10), %s1217_s30, 0 }
  0x4f   : > { %278 = sbr.rel (%p1226_p10) target bundleno = 859 (0x35b), region = 48  ;;  %s698_s13 = sshll.u32 (!%p1226_p10), %s1137_s11, 3 }
  0x50   : > { %s281_s1 = scalar_lea.sflag (!%p1226_p10), [#allocation3], %s1137_s11  ;;  %s1143_s3 = scalar_lea.vmem (!%p1226_p10), [#allocation2], %s698_s13 }
  0x54   : > { %943 = dma.done.wait (%p1227_p4), %s281_s1, 128  }
  0x55   : > { %945 = vsyncadd (%p1227_p4), %s281_s1, 4294967168  ;;  %p1228_p8 = scmp.eq.s32.totalorder %s1040_s28, 0 }
  0x57   : > { %947 = dma.done.wait (%p1228_p8), [#allocation6], 8192   ;;  %p1229_p7 = pmov %p1228_p8 }
  0x58   : > { %v977_v0 = vmov 0.0   ;;  %v355_v1 = vld [vmem:[#allocation5 + $0xf8] sm:$0xff]  ;;  %v354_v2 = vld [vmem:[#allocation5 + $0xf0] sm:$0xff]  ;;  %v353_v3 = vld [vmem:[#allocation5 + $0xe8] sm:$0xff]  ;;  %s706_s19 = sshll.u32 %s1040_s28, 7  ;;  %s322_s17 = scalar_lea.vmem [#allocation8], %s698_s13 }
  0x59   : > { %949 = vsyncadd (%p1229_p7), [#allocation6], 4294959104  ;;  %432 = vmatprep.mubr.f32.mxu0 %v977_v0  ;;  %368 = vmatprep.subr.mxu0 %v355_v1  ;;  %v352_v4 = vld [vmem:[#allocation5 + $0xe0] sm:$0xff]  ;;  %v351_v5 = vld [vmem:[#allocation5 + $0xd8] sm:$0xff]  ;;  %s601_s21 = sshll.u32 %s322_s17, 4  ;;  %s588_s30 = scalar_lea.sflag [#allocation4], %s1137_s11  ;;  %s602_s21 = int_to_ptr.vmem [resolvable:$true] %s601_s21 }
  0x5a   : > { %369 = vmatpush1.msra.mxu0 %v354_v2  ;;  %v350_v6 = vld [vmem:[#allocation5 + $0xd0] sm:$0xff]  ;;  %v349_v7 = vld [vmem:[#allocation5 + $0xc8] sm:$0xff]  ;;  %v348_v8 = vld [vmem:[#allocation5 + $0xc0] sm:$0xff]  ;;  %v358_v2 = vlaneseq  ;;  %s900_s9 = scalar_lea.vmem %s602_s21, 128  ;;  %p1230_p0 = scmp.ne.s32.totalorder %s1224_s16, 0 }
  0x5b   : > { %370 = vmatprep.subr.mxu0 %v353_v3  ;;  %v347_v9 = vld [vmem:[#allocation5 + $0xb8] sm:$0xff]  ;;  %v346_v10 = vld [vmem:[#allocation5 + $0xb0] sm:$0xff]  ;;  %v345_v11 = vld [vmem:[#allocation5 + $0xa8] sm:$0xff]  ;;  %p901_p11 = scmp.ne.s32.totalorder %s602_s21, %s900_s9  ;;  %s978_s20 = smov [#allocation8]  }
  0x5c   : > { %371 = vmatpush1.msra.mxu0 %v352_v4  ;;  %v344_v12 = vld [vmem:[#allocation5 + $0xa0] sm:$0xff]  ;;  %v343_v13 = vld [vmem:[#allocation5 + $0x98] sm:$0xff]  ;;  %v342_v14 = vld [vmem:[#allocation5 + $0x90] sm:$0xff]  ;;  %v359_v3 = vshrl.u32 %v358_v2, 7  ;;  %s904_s22 = sshll.u32 %s978_s20, 4  ;;  %s905_s22 = int_to_ptr.vmem [resolvable:$false] %s904_s22 }
  0x5d   : > { %372 = vmatprep.subr.mxu0 %v351_v5  ;;  %v472_v15 = vld [vmem:[#allocation7 + $0xf8] sm:$0xff]  ;;  %v471_v17 = vld [vmem:[#allocation7 + $0xf0] sm:$0xff]  ;;  %v341_v18 = vld [vmem:[#allocation5 + $0x88] sm:$0xff]  ;;  %p902_p1 = pnand %p901_p11, %p1230_p0  ;;  %s906_s28 = scalar_lea.vmem %s905_s22, 256 }
  0x5e   : > { %373 = vmatpush1.msra.mxu0 %v350_v6  ;;  %v456_v16 = vld [vmem:[#allocation7 + $0x78] sm:$0xff]  ;;  %709 = vmatprep.subr.mxu1 %v472_v15  ;;  %v455_v19 = vld [vmem:[#allocation7 + $0x70] sm:$0xff]  ;;  %v340_v20 = vld [vmem:[#allocation5 + $0x80] sm:$0xff]  ;;  %v360_v4 = vsub.s32 0, %v359_v3  ;;  %v364_v6 = vsub.s32 1, %v359_v3  ;;  %p907_p6 = scmp.lt.s32.totalorder %s602_s21, %s905_s22  ;;  %p908_p12 = scmp.lt.s32.totalorder %s906_s28, %s900_s9 }
  0x5f   : > { %374 = vmatprep.subr.mxu0 %v349_v7  ;;  %710 = vmatpush3.msra.mxu1 %v456_v16  ;;  %v470_v21 = vld [vmem:[#allocation7 + $0xe8] sm:$0xff]  ;;  %v339_v22 = vld [vmem:[#allocation5 + $0x78] sm:$0xff]  ;;  %v338_v24 = vld [vmem:[#allocation5 + $0x70] sm:$0xff]  ;;  %p903_p2 = pneg %p902_p1 }
  0x60   : > { %375 = vmatpush1.msra.mxu0 %v348_v8  ;;  %711 = vmatprep.subr.mxu1 %v471_v17  ;;  %v454_v23 = vld [vmem:[#allocation7 + $0x68] sm:$0xff]  ;;  %v469_v25 = vld [vmem:[#allocation7 + $0xe0] sm:$0xff]  ;;  %v468_v29 = vld [vmem:[#allocation7 + $0xd8] sm:$0xff]  ;;  %p909_p3 = por %p908_p12, %p907_p6 }
  0x61   : > { %376 = vmatprep.subr.mxu0 %v347_v9  ;;  %712 = vmatpush3.msra.mxu1 %v455_v19  ;;  %v337_v26 = vld [vmem:[#allocation5 + $0x68] sm:$0xff]  ;;  %v453_v27 = vld [vmem:[#allocation7 + $0x60] sm:$0xff]  ;;  %v335_v30 = vld [vmem:[#allocation5 + $0x58] sm:$0xff] }
  0x62   : > { %377 = vmatpush1.msra.mxu0 %v346_v10  ;;  %713 = vmatprep.subr.mxu1 %v470_v21  ;;  %v336_v28 = vld [vmem:[#allocation5 + $0x60] sm:$0xff]  ;;  %v452_v31 = vld [vmem:[#allocation7 + $0x58] sm:$0xff]  ;;  %v334_v32 = vld [vmem:[#allocation5 + $0x50] sm:$0xff]  ;;  %p910_p9 = pnand %p909_p3, %p903_p2 }
  0x63   : > { %378 = vmatprep.subr.mxu0 %v345_v11  ;;  %714 = vmatpush3.msra.mxu1 %v454_v23  ;;  %v467_v33 = vld [vmem:[#allocation7 + $0xd0] sm:$0xff]  ;;  %v333_v34 = vld [vmem:[#allocation5 + $0x48] sm:$0xff]  ;;  %v332_v36 = vld [vmem:[#allocation5 + $0x40] sm:$0xff] }
  0x64   : > { %379 = vmatpush1.msra.mxu0 %v344_v12  ;;  %715 = vmatprep.subr.mxu1 %v469_v25  ;;  %v451_v35 = vld [vmem:[#allocation7 + $0x50] sm:$0xff]  ;;  %v466_v37 = vld [vmem:[#allocation7 + $0xc8] sm:$0xff]  ;;  %v331_v38 = vld [vmem:[#allocation5 + $0x38] sm:$0xff] }
  0x65   : > { %380 = vmatprep.subr.mxu0 %v343_v13  ;;  %716 = vmatpush3.msra.mxu1 %v453_v27  ;;  %v450_v39 = vld [vmem:[#allocation7 + $0x48] sm:$0xff]  ;;  %v330_v40 = vld [vmem:[#allocation5 + $0x30] sm:$0xff]  ;;  %v465_v41 = vld [vmem:[#allocation7 + $0xc0] sm:$0xff] }
  0x66   : > { %381 = vmatpush1.msra.mxu0 %v342_v14  ;;  %717 = vmatprep.subr.mxu1 %v468_v29  ;;  %v329_v42 = vld [vmem:[#allocation5 + $0x28] sm:$0xff]  ;;  %v449_v43 = vld [vmem:[#allocation7 + $0x40] sm:$0xff]  ;;  %v464_v45 = vld [vmem:[#allocation7 + $0xb8] sm:$0xff] }
  0x67   : > { %382 = vmatprep.subr.mxu0 %v341_v18  ;;  %718 = vmatpush3.msra.mxu1 %v452_v31  ;;  %v328_v44 = vld [vmem:[#allocation5 + $0x20] sm:$0xff]  ;;  %v327_v46 = vld [vmem:[#allocation5 + $0x18] sm:$0xff]  ;;  %v326_v48 = vld [vmem:[#allocation5 + $0x10] sm:$0xff] }
  0x68   : > { %383 = vmatpush1.msra.mxu0 %v340_v20  ;;  %719 = vmatprep.subr.mxu1 %v467_v33  ;;  %v448_v47 = vld [vmem:[#allocation7 + $0x38] sm:$0xff]  ;;  %v463_v49 = vld [vmem:[#allocation7 + $0xb0] sm:$0xff]  ;;  %v325_v50 = vld [vmem:[#allocation5 + $0x8] sm:$0xff] }
  0x69   : > { %384 = vmatprep.subr.mxu0 %v339_v22  ;;  %720 = vmatpush3.msra.mxu1 %v451_v35  ;;  %v447_v51 = vld [vmem:[#allocation7 + $0x30] sm:$0xff]  ;;  %v324_v52 = vld [vmem:[#allocation5] sm:$0xff]  ;;  %v462_v53 = vld [vmem:[#allocation7 + $0xa8] sm:$0xff] }
  0x6a   : > { %385 = vmatpush1.msra.mxu0 %v338_v24  ;;  %721 = vmatprep.subr.mxu1 %v466_v37  ;;  %v323_v54 = vld [vmem:[%s1143_s3] sm:$0xff]  ;;  %v446_v55 = vld [vmem:[#allocation7 + $0x28] sm:$0xff]  ;;  %v461_v56 = vld [vmem:[#allocation7 + $0xa0] sm:$0xff]  ;;  %s599_s3 = scalar_lea.hbm %s1210_s7, %s706_s19 }
  0x6b   : > { %386 = vmatprep.subr.mxu0 %v337_v26  ;;  %722 = vmatpush3.msra.mxu1 %v450_v39  ;;  %v445_v57 = vld [vmem:[#allocation7 + $0x20] sm:$0xff]  ;;  %v460_v58 = vld [vmem:[#allocation7 + $0x98] sm:$0xff]  ;;  %v459_v60 = vld [vmem:[#allocation7 + $0x90] sm:$0xff] }
  0x6c   : > { %387 = vmatpush1.msra.mxu0 %v336_v28  ;;  %723 = vmatprep.subr.mxu1 %v465_v41  ;;  %v444_v59 = vld [vmem:[#allocation7 + $0x18] sm:$0xff]  ;;  %v443_v61 = vld [vmem:[#allocation7 + $0x10] sm:$0xff]  ;;  %v458_v62 = vld [vmem:[#allocation7 + $0x88] sm:$0xff] }
  0x6d   : > { %388 = vmatprep.subr.mxu0 %v335_v30  ;;  %724 = vmatpush3.msra.mxu1 %v449_v43  ;;  %v442_v63 = vld [vmem:[#allocation7 + $0x8] sm:$0xff]  ;;  %v457_v0 = vld [vmem:[#allocation7 + $0x80] sm:$0xff]  ;;  %v356_v5 = vld [vmem:[%s1205_s2] sm:$0x3] }
  0x6e   : > { %389 = vmatpush1.msra.mxu0 %v334_v32  ;;  %725 = vmatprep.subr.mxu1 %v464_v45  ;;  %v441_v1 = vld [vmem:[#allocation7] sm:$0xff]  ;;  %v361_v7 = vrot.slane %v356_v5, %v360_v4  ;;  %v365_v8 = vrot.slane %v356_v5, %v364_v6  ;;  %v702_v16 = vld [vmem:[%s1207_s4] ss:$0 sm:$0xff] }
  0x6f   : > { %390 = vmatprep.subr.mxu0 %v333_v34  ;;  %726 = vmatpush3.msra.mxu1 %v448_v47  ;;  %v703_v34 = vld [vmem:[%s1208_s5] ss:$0 sm:$0xff] }
  0x70   : > { %391 = vmatpush1.msra.mxu0 %v332_v36  ;;  %727 = vmatprep.subr.mxu1 %v463_v49  ;;  %v704_v36 = vld [vmem:[%s1209_s6] ss:$0 sm:$0xff] }
  0x71   : > { %392 = vmatprep.subr.mxu0 %v331_v38  ;;  %728 = vmatpush3.msra.mxu1 %v447_v51 }
  0x72   : > { %393 = vmatpush1.msra.mxu0 %v330_v40  ;;  %729 = vmatprep.subr.mxu1 %v462_v53 }
  0x73   : > { %394 = vmatprep.subr.mxu0 %v329_v42  ;;  %730 = vmatpush3.msra.mxu1 %v446_v55 }
  0x74   : > { %395 = vmatpush1.msra.mxu0 %v328_v44  ;;  %731 = vmatprep.subr.mxu1 %v461_v56 }
  0x75   : > { %396 = vmatprep.subr.mxu0 %v327_v46  ;;  %732 = vmatpush3.msra.mxu1 %v445_v57 }
  0x76   : > { %397 = vmatpush1.msra.mxu0 %v326_v48  ;;  %733 = vmatprep.subr.mxu1 %v460_v58 }
  0x77   : > { %398 = vmatprep.subr.mxu0 %v325_v50  ;;  %734 = vmatpush3.msra.mxu1 %v444_v59 }
  0x78   : > { %399 = vmatpush1.msra.mxu0 %v324_v52  ;;  %735 = vmatprep.subr.mxu1 %v459_v60 }
  0x79   : > { %433 = vmatmul.mubr.f32.vlgmr.msra.gmra.mxu0 %v323_v54  ;;  %736 = vmatpush3.msra.mxu1 %v443_v61 }
  0x7a   : > { %737 = vmatprep.subr.mxu1 %v458_v62 }
  0x7b   : > { %738 = vmatpush3.msra.mxu1 %v442_v63 }
  0x7c   : > { %739 = vmatprep.subr.mxu1 %v457_v0 }
  0x7d   : > { %740 = vmatpush3.msra.mxu1 %v441_v1 }
 0x139   : > { %v434_v9 = vpop.f32.mrf.mxu0 }
 0x13a   : > { %v435_v10 = vadd.f32 %v434_v9, %v361_v7 }
 0x13b   : > { %v436_v11 = vpop.f32.mrf.mxu0 }
 0x13c   : > { %v437_v12 = vadd.f32 %v436_v11, %v365_v8  ;;  %v439_v14 = vmax.f32 %v435_v10, 0.0 }
 0x13e   : > { %v440_v13 = vmax.f32 %v437_v12, 0.0 }
 0x140   : > { %544 = vmatprep.mubr.f32.mxu1 %v440_v13 }
 0x141   : > { %545 = vmatmul.mubr.f32.vlgmr.msra.gmra.mxu1 %v439_v14 }
 0x201   : > { %v741_v15 = vpop.f32.mrf.mxu1 }
 0x203   : > { %v742_v17 = vpop.f32.mrf.mxu1 }
 0x204   : > { %v743_v18 = vadd.f32 %v742_v17, %v741_v15 }
 0x206   : > { %v547_v19 = vadd.f32 %v743_v18, %v702_v16 }
 0x208   : > { %v550_v20 = vadd.f32 %v547_v19, %v323_v54 }
 0x20a   : > { %551 = vadd.xlane.f32.xlu0 %v550_v20 }
 0x293   : > { %v552_v21 = vpop.xlane.xlu0 %551 }
 0x294   : > { %v554_v22 = vmul.f32 0.0078125, %v552_v21 }
 0x296   : > { %v555_v23 = vsub.f32 %v550_v20, %v554_v22 }
 0x298   : > { %v556_v24 = vmul.f32 %v555_v23, %v555_v23 }
 0x29a   : > { %557 = vadd.xlane.f32.xlu0 %v556_v24 }
 0x323   : > { %v558_v25 = vpop.xlane.xlu0 %557 }
 0x324   : > { %v559_v26 = vmul.f32 0.007874016, %v558_v25 }
 0x326   : > { %816 = vrsqrt.f32 %v559_v26  ;;  %vm562_vm0 = vcmp.eq.f32.partialorder %v559_v26, inf  ;;  %v565_v29 = vand.u32 2147483648, %v559_v26  ;;  %vm564_vm1 = vcmp.eq.f32.partialorder %v559_v26, 0.0 }
 0x333   : > { %v817_v27 = vpop.eup %816 }
 0x334   : > { %v561_v28 = vmul.f32 %v817_v27, %v559_v26 }
 0x336   : > { %v563_v30 = vsel %vm562_vm0, %v559_v26, %v561_v28 }
 0x337   : > { %v566_v31 = vsel %vm564_vm1, %v565_v29, %v563_v30 }
 0x338   : > { %v567_v32 = vadd.f32 1e-08, %v566_v31 }
 0x33a   : > { %818 = vrcp.f32 %v567_v32 }
 0x347   : > { %v819_v33 = vpop.eup %818 }
 0x348   : > { %v569_v35 = vmul.f32 %v819_v33, %v555_v23 }
 0x34a   : > { %v577_v37 = vmul.f32 %v703_v34, %v569_v35 }
 0x34c   : > { %v585_v38 = vadd.f32 %v704_v36, %v577_v37 }
 0x34e   : > { %586 = vst [vmem:[%s322_s17] sm:$0xff] %v585_v38 }
 0x34f   : > { %913 = shalt.err (!%p910_p9)
}
 0x350   : > { %s914_s13 = scalar_lea.hbm %s599_s3, 128  ;;  %s918_s29 = scalar_lea.hbm %s1210_s7, 256 }
 0x351   : > { %p915_p13 = scmp.ne.s32.totalorder %s599_s3, %s914_s13  ;;  %p919_p4 = scmp.lt.s32.totalorder %s599_s3, %s1210_s7 }
 0x352   : > { %p920_p8 = scmp.lt.s32.totalorder %s918_s29, %s914_s13 }
 0x353   : > { %p916_p5 = pnand %p915_p13, %p1230_p0 }
 0x354   : > { %p921_p7 = por %p920_p8, %p919_p4 }
 0x355   : > { %p917_p10 = pneg %p916_p5 }
 0x357   : > { %p922_p11 = pnand %p921_p7, %p917_p10 }
 0x359   : > { %925 = shalt.err (!%p922_p11)
}
 0x35a   : > { %754 = dma.vmem_to_hbm [thread:$0]  (%p1230_p0), %s602_s21, 128, %s599_s3, %s588_s30  }
 0x35b PF: > { %s613_s19 = sand.u32 1, %s956_s24   ;;  %p1231_p1 = scmp.ne.s32.totalorder %s1218_s8, 0 }
 0x35c   : > { %p1232_p2 = scmp.ge.s32.totalorder %s968_s27, 2  ;;  %s614_s17 = scalar_lea.sflag [#allocation4], %s613_s19 }
 0x35e   : > { %p768_p6 = pnand %p1232_p2, %p1231_p1 }
 0x360   : > { %p769_p12 = pneg %p768_p6 }
 0x362   : > { %951 = dma.done.wait (%p769_p12), %s614_s17, 128  }
 0x363   : > { %953 = vsyncadd (%p769_p12), %s614_s17, 4294967168  ;;  %p21_p3 = scmp.ge.s32.totalorder %s1091_s10, 4   ;;  %s1233_s24 = smov %s960_s25 }
 0x364   : > { %s1234_s25 = smov %s964_s26  ;;  %s1235_s26 = smov %s1100_s15 }
 0x365   : > { %s1236_s27 = smov %s1091_s10  ;;  %23 = sbr.rel (!%p21_p3) target bundleno = 9 (0x9), region = 101 }
 0x36a   :  { %619 = vsyncpa [#allocation3], 1 }
 0x36b   :  { %621 = vsyncpa [#allocation3 + $0x1], 1 }
 0x36c   :  { %622 = vsyncpa [#allocation6], 1 }
 0x36d   :  { %623 = vsyncpa [#allocation4], 1 }
 0x36e   :  { %625 = vsyncpa [#allocation4 + $0x1], 1 }

</bundles_post_ra>
